<compile_context>
chip_gen: v6e
topology: v6e:2x2x1
jax: 0.10.0
libtpu: 0.0.40
codegen_flags: <defaults>
</compile_context>

<pallas_src>
import jax
import jax.numpy as jnp
from jax import lax
from jax.experimental import pallas as pl
from jax.experimental.pallas import tpu as pltpu

LANE = 128


def rnn_generative_kernel(ids_ref, w_ref, bout_ref, out_ref):
    """Single-step RNN decode, fully folded.

    ids  : (B, 1)       int32  token ids
    w    : (2, N, N)    bf16   packed weights:
                               w[0][:V, :H] = tanh(emb_table @ W_ih^T + b_ih + b_hh)
                               w[1][:H, :V] = W_out^T          (rest zeros)
    bout : (1, N)       f32    b_out, padded columns = -1e30
    out  : (B, N)       f32    log-probs over the padded vocab (lane-dense)
    """
    b = ids_ref.shape[0]
    n = w_ref.shape[2]

    # In-kernel embedding gather as a lane-dense one-hot matmul (lossless row
    # selection on the MXU; no serial dynamic row slices, no XLA gather).
    ids = ids_ref[...]                                              # (B, 1)
    col = lax.broadcasted_iota(jnp.int32, (b, n), 1)                # (B, N)
    one_hot = (ids == col).astype(jnp.bfloat16)                     # (B, N)

    # h1 = tanh(emb @ W_ih^T + b_ih + b_hh) via the precomputed table.
    h1 = jnp.dot(one_hot, w_ref[0],
                 preferred_element_type=jnp.float32)                # (B, N)

    # Dropout: identity at inference time.  Output projection (padded W_out^T
    # rows beyond H are zero, so the padded h1 columns contribute nothing).
    logits = jnp.dot(h1.astype(jnp.bfloat16), w_ref[1],
                     preferred_element_type=jnp.float32) + bout_ref[...]

    # LogSoftmax over the (padded) vocab dim: padded columns carry -1e30 bias,
    # so they cannot win the max and contribute exp(.) == 0 to the normalizer.
    m = jnp.max(logits, axis=-1, keepdims=True)
    shifted = logits - m
    lse = jnp.log(jnp.sum(jnp.exp(shifted), axis=-1, keepdims=True))
    out_ref[...] = shifted - lse


def prepare_kernel_params(params):
    """One-time offline fold of raw f32 params into the kernel-ready layout."""
    vocab, _ = params["embedding"].shape
    hidden = params["wih_t"].shape[1]
    n = ((max(vocab, hidden) + LANE - 1) // LANE) * LANE

    # h0 == 0  =>  h1 depends only on the token id: precompute the whole
    # post-tanh table in f32, store bf16.
    h1_table = jnp.tanh(params["embedding"] @ params["wih_t"]
                        + params["bih"] + params["bhh"])            # (V, H) f32

    w1 = jnp.zeros((n, n), jnp.float32).at[:vocab, :hidden].set(h1_table)
    w2 = jnp.zeros((n, n), jnp.float32).at[:hidden, :vocab].set(params["wout_t"])
    w_pack = jnp.stack([w1, w2], axis=0).astype(jnp.bfloat16)       # (2, N, N)

    bout = jnp.full((1, n), -1e30, jnp.float32).at[:, :vocab].set(
        params["bout"][0].astype(jnp.float32))

    return {"w_pack": w_pack, "bout": bout, "vocab": vocab, "n": n}


def rnn_generative_forward(x_input, kp):
    """x_input: (B,) int token ids in [0, vocab). Returns (B, vocab) f32 log-probs."""
    w_pack, bout, vocab, n = kp["w_pack"], kp["bout"], kp["vocab"], kp["n"]
    b = x_input.shape[0]

    ids2d = x_input.reshape(b, 1).astype(jnp.int32)

    vmem = pl.BlockSpec(memory_space=pltpu.MemorySpace.VMEM)

    flops = 2 * b * n * n * 2                       # two (B,N)@(N,N) matmuls
    transcendentals = b * n + b                     # exp + log
    bytes_accessed = (ids2d.size * 4 + w_pack.size * 2 + bout.size * 4
                      + b * n * 4)

    out_padded = pl.pallas_call(
        rnn_generative_kernel,
        out_shape=jax.ShapeDtypeStruct((b, n), jnp.float32),
        in_specs=[vmem, vmem, vmem],
        out_specs=vmem,
        cost_estimate=pl.CostEstimate(flops=flops,
                                      transcendentals=transcendentals,
                                      bytes_accessed=bytes_accessed),
    )(ids2d, w_pack, bout)

    # Slice off the lane padding in the wrapper (cheap XLA slice).
    # TODO(synk): fuse the downstream consumer instead of slicing per token.
    return out_padded[:, :vocab]


def init_params(key, vocab, emb_dim, hidden):
    ks = jax.random.split(key, 7)
    scale = 0.1
    return {
        "embedding": scale * jax.random.normal(ks[0], (vocab, emb_dim), jnp.float32),
        "wih_t":     scale * jax.random.normal(ks[1], (emb_dim, hidden), jnp.float32),
        "bih":       scale * jax.random.normal(ks[2], (1, hidden), jnp.float32),
        "whh_t":     scale * jax.random.normal(ks[3], (hidden, hidden), jnp.float32),
        "bhh":       scale * jax.random.normal(ks[4], (1, hidden), jnp.float32),
        "wout_t":    scale * jax.random.normal(ks[5], (hidden, vocab), jnp.float32),
        "bout":      scale * jax.random.normal(ks[6], (1, vocab), jnp.float32),
    }


if __name__ == "__main__":
    # Small shapes consistent with the module: vocab=input_size=64, emb=32,
    # hidden=32, batch=8.
    VOCAB, EMB, HIDDEN, BATCH = 64, 32, 32, 8

    key = jax.random.PRNGKey(0)
    pkey, xkey = jax.random.split(key)
    params = init_params(pkey, VOCAB, EMB, HIDDEN)
    kparams = prepare_kernel_params(params)
    x_input = jax.random.randint(xkey, (BATCH,), 0, VOCAB, dtype=jnp.int32)

    out = rnn_generative_forward(x_input, kparams)
    jax.block_until_ready(out)

    # Pure-JAX f32 reference (h0 == 0, dropout identity); bf16 folded tables in
    # the kernel => loose tolerance.
    emb_ref = params["embedding"][x_input]
    pre_ref = emb_ref @ params["wih_t"] + params["bih"] + params["bhh"]
    logits_ref = jnp.tanh(pre_ref) @ params["wout_t"] + params["bout"]
    ref = jax.nn.log_softmax(logits_ref, axis=-1)

    assert out.shape == (BATCH, VOCAB)
    row_sums = jnp.sum(jnp.exp(out), axis=-1)
    assert bool(jnp.all(jnp.abs(row_sums - 1.0) < 1e-3))
    assert bool(jnp.max(jnp.abs(out - ref)) < 5e-2)

    print("KERNEL_OK")
</pallas_src>

<mosaic_0001>
module attributes {stable_mosaic.version = 11 : i64} {
  func.func @rnn_generative_kernel(%arg0: memref<8x1xi32, #tpu.memory_space<vmem>>, %arg1: memref<2x128x128xbf16, #tpu.memory_space<vmem>>, %arg2: memref<1x128xf32, #tpu.memory_space<vmem>>, %arg3: memref<8x128xf32, #tpu.memory_space<vmem>>) attributes {dimension_semantics = [], scalar_prefetch = 0 : i64, scratch_operands = 0 : i64, tpu.core_type = #tpu.core_type<tc>} {
    %c0 = arith.constant 0 : index
    %c0_0 = arith.constant 0 : index
    %0 = vector.load %arg0[%c0, %c0_0] : memref<8x1xi32, #tpu.memory_space<vmem>>, vector<8x1xi32>
    %1 = tpu.iota {dimensions = array<i32: 1>} : vector<8x128xi32>
    %2 = vector.broadcast %0 : vector<8x1xi32> to vector<8x128xi32>
    %3 = arith.cmpi eq, %2, %1 : vector<8x128xi32>
    %4 = arith.extui %3 : vector<8x128xi1> to vector<8x128xi32>
    %5 = arith.sitofp %4 : vector<8x128xi32> to vector<8x128xf32>
    %6 = arith.truncf %5 : vector<8x128xf32> to vector<8x128xbf16>
    %c0_1 = arith.constant 0 : index
    %c0_2 = arith.constant 0 : index
    %c0_3 = arith.constant 0 : index
    %7 = vector.load %arg1[%c0_1, %c0_2, %c0_3] : memref<2x128x128xbf16, #tpu.memory_space<vmem>>, vector<1x128x128xbf16>
    %8 = vector.shape_cast %7 : vector<1x128x128xbf16> to vector<128x128xbf16>
    %cst = arith.constant dense<0.000000e+00> : vector<8x128xf32>
    %9 = tpu.matmul %6, %8, %cst {dimension_numbers = #tpu.dot_dimension_numbers<[1], [0], [0], [1], [0, 0, 1, 1], [], []>} : vector<8x128xbf16>, vector<128x128xbf16>, vector<8x128xf32> -> vector<8x128xf32>
    %10 = arith.truncf %9 : vector<8x128xf32> to vector<8x128xbf16>
    %c1 = arith.constant 1 : index
    %c0_4 = arith.constant 0 : index
    %c0_5 = arith.constant 0 : index
    %11 = vector.load %arg1[%c1, %c0_4, %c0_5] : memref<2x128x128xbf16, #tpu.memory_space<vmem>>, vector<1x128x128xbf16>
    %12 = vector.shape_cast %11 : vector<1x128x128xbf16> to vector<128x128xbf16>
    %cst_6 = arith.constant dense<0.000000e+00> : vector<8x128xf32>
    %13 = tpu.matmul %10, %12, %cst_6 {dimension_numbers = #tpu.dot_dimension_numbers<[1], [0], [0], [1], [0, 0, 1, 1], [], []>} : vector<8x128xbf16>, vector<128x128xbf16>, vector<8x128xf32> -> vector<8x128xf32>
    %c0_7 = arith.constant 0 : index
    %c0_8 = arith.constant 0 : index
    %14 = vector.load %arg2[%c0_7, %c0_8] : memref<1x128xf32, #tpu.memory_space<vmem>>, vector<1x128xf32>
    %15 = vector.broadcast %14 : vector<1x128xf32> to vector<8x128xf32>
    %16 = arith.addf %13, %15 : vector<8x128xf32>
    %cst_9 = arith.constant dense<0xFF800000> : vector<8xf32>
    %17 = vector.multi_reduction <maximumf>, %16, %cst_9 [1] : vector<8x128xf32> to vector<8xf32>
    %18 = vector.shape_cast %17 : vector<8xf32> to vector<8x1xf32>
    %19 = vector.broadcast %18 : vector<8x1xf32> to vector<8x128xf32>
    %20 = arith.subf %16, %19 : vector<8x128xf32>
    %21 = math.exp %20 : vector<8x128xf32>
    %cst_10 = arith.constant dense<0.000000e+00> : vector<8xf32>
    %22 = vector.multi_reduction <add>, %21, %cst_10 [1] : vector<8x128xf32> to vector<8xf32>
    %23 = vector.shape_cast %22 : vector<8xf32> to vector<8x1xf32>
    %24 = math.log %23 : vector<8x1xf32>
    %25 = vector.broadcast %24 : vector<8x1xf32> to vector<8x128xf32>
    %26 = arith.subf %20, %25 : vector<8x128xf32>
    %c0_11 = arith.constant 0 : index
    %c0_12 = arith.constant 0 : index
    %27 = vector.load %arg3[%c0_11, %c0_12] : memref<8x128xf32, #tpu.memory_space<vmem>>, vector<8x128xf32>
    tpu.vector_store %arg3[%c0_11, %c0_12], %26 {strides = array<i32>} : memref<8x128xf32, #tpu.memory_space<vmem>>, vector<8x128xf32>,
    return
  }
}

</mosaic_0001>

<bundles_post_ra>
// kernel: tpu_custom_call.1
= control target key start
LH: loop header
LB: loop body
LE: loop exit
PB: predicated region body
PF: predicated region fallthrough
CT: control target
= control target key end

     0   :  { %8 = vsyncpa [#allocation3], 0  ;;  %s474_s0 = inlined_call_operand.vmem [shape: s32[8,1], index: 0, kind: input, shape index: {}]   ;;  %s475_s1 = inlined_call_operand.hbm [shape: bf16[2,128,128], index: 1, kind: input, shape index: {}]   ;;  %s476_s2 = inlined_call_operand.vmem [shape: f32[1,128], index: 2, kind: input, shape index: {}]   ;;  %s477_s3 = inlined_call_operand.hbm [shape: f32[8,128], index: 3, kind: output, shape index: {}]  }
   0x1   :  { %9 = vsyncpa [#allocation4], 0  ;;  %s434_s12 = smov [#allocation2]  }
   0x2   :  { %s17_s13 = sshll.u32 %s434_s12, 4  ;;  %s18_s13 = int_to_ptr.vmem [resolvable:$true] %s17_s13 }
   0x3   :  { %s398_s14 = scalar_lea.vmem %s18_s13, 2048  ;;  %p403_p1 = scmp.lt.s32.totalorder %s18_s13, %s18_s13 }
   0x4   :  { %p399_p0 = scmp.ne.s32.totalorder %s18_s13, %s398_s14  ;;  %p404_p2 = scmp.lt.s32.totalorder %s398_s14, %s398_s14 }
   0x6   :  { %p405_p3 = por %p404_p2, %p403_p1 }
   0x8   :  { %p406_p4 = pnand %p405_p3, %p399_p0 }
   0xa   :  { %409 = shalt.err (!%p406_p4)
}
   0xb   :  { %s435_s15 = smov 64   ;;  %s436_s16 = smov 4  }
   0xc   :  { %23 = dma.hbm_to_vmem [thread:$0]  %s475_s1, 2048, %s18_s13, [#allocation3], %s435_s15, %s435_s15, %s436_s16  }
   0xd   :  { %430 = dma.done.wait [#allocation3], 2048  }
   0xe   :  { %431 = vsyncadd [#allocation3], 4294965248  ;;  %v437_v0 = vmov 0   ;;  %v438_v1 = vmov 0.0   ;;  %vm439_vm0 = vmmov 0   ;;  %v30_v2 = vld [vmem:[%s474_s0] sm:$0xff]  ;;  %v31_v18 = vlaneseq }
   0xf   :  { %369 = vset.pattern.permute.xlu0 %v437_v0  ;;  %321 = vmatprep.subr.bf16.mxu0 %v438_v1  ;;  %v370_v3 = vld [vmem:[#allocation2 + $0x38] sm:$0xff]   ;;  %v371_v4 = vld [vmem:[#allocation2 + $0x30] sm:$0xff]   ;;  %v372_v5 = vld [vmem:[#allocation2 + $0x28] sm:$0xff]   ;;  %v440_v21 = vmov 1.0|1.0   ;;  %s441_s21 = smov [#allocation5]  }
  0x10   :  { %341 = vmatprep.subr.bf16.mxu1 %v438_v1  ;;  %337 = vmatprep.mubr.msk.bf16.mxu0 %vm439_vm0, %v438_v1  ;;  %v378_v6 = vld [vmem:[#allocation2 + $0x78] sm:$0xff]   ;;  %v373_v7 = vld [vmem:[#allocation2 + $0x20] sm:$0xff]   ;;  %v379_v8 = vld [vmem:[#allocation2 + $0x70] sm:$0xff]   ;;  %v32_v19 = vand.u32 127, %v31_v18  ;;  %s274_s22 = sshll.u32 %s441_s21, 4  ;;  %s275_s22 = int_to_ptr.vmem [resolvable:$true] %s274_s22 }
  0x11   :  { %357 = vmatprep.mubr.msk.bf16.mxu1 %vm439_vm0, %v438_v1  ;;  %34 = vperm.xlu0 %369, %v30_v2   ;;  %v374_v9 = vld [vmem:[#allocation2 + $0x18] sm:$0xff]   ;;  %v380_v10 = vld [vmem:[#allocation2 + $0x68] sm:$0xff]   ;;  %v375_v11 = vld [vmem:[#allocation2 + $0x10] sm:$0xff]   ;;  %p415_p6 = scmp.lt.s32.totalorder %s275_s22, %s275_s22 }
  0x12   :  { %322 = vmatpush3.bf16.msra.mxu0 %v370_v3  ;;  %342 = vmatpush3.bf16.msra.mxu1 %v378_v6  ;;  %v381_v12 = vld [vmem:[#allocation2 + $0x60] sm:$0xff]   ;;  %v376_v13 = vld [vmem:[#allocation2 + $0x8] sm:$0xff]   ;;  %v382_v14 = vld [vmem:[#allocation2 + $0x58] sm:$0xff]  }
  0x13   :  { %323 = vmatprep.subr.bf16.mxu0 %v438_v1  ;;  %343 = vmatprep.subr.bf16.mxu1 %v438_v1  ;;  %v377_v15 = vld [vmem:[#allocation2] sm:$0xff]   ;;  %v383_v16 = vld [vmem:[#allocation2 + $0x50] sm:$0xff]   ;;  %v384_v17 = vld [vmem:[#allocation2 + $0x48] sm:$0xff]  }
  0x14   :  { %v385_v22 = vld [vmem:[#allocation2 + $0x40] sm:$0xff]  }
  0x15   :  { %v294_v28 = vld [vmem:[%s476_s2] ss:$0 sm:$0xff]  ;;  %s410_s2 = scalar_lea.vmem %s275_s22, 128 }
  0x16   :  { %324 = vmatpush3.bf16.msra.mxu0 %v371_v4  ;;  %344 = vmatpush3.bf16.msra.mxu1 %v379_v8  ;;  %p411_p5 = scmp.ne.s32.totalorder %s275_s22, %s410_s2  ;;  %p416_p7 = scmp.lt.s32.totalorder %s410_s2, %s410_s2 }
  0x17   :  { %325 = vmatprep.subr.bf16.mxu0 %v438_v1  ;;  %345 = vmatprep.subr.bf16.mxu1 %v438_v1 }
  0x18   :  { %p417_p8 = por %p416_p7, %p415_p6 }
  0x1a   :  { %326 = vmatpush3.bf16.msra.mxu0 %v372_v5  ;;  %346 = vmatpush3.bf16.msra.mxu1 %v380_v10  ;;  %p418_p9 = pnand %p417_p8, %p411_p5 }
  0x1b   :  { %327 = vmatprep.subr.bf16.mxu0 %v438_v1  ;;  %347 = vmatprep.subr.bf16.mxu1 %v438_v1 }
  0x1e   :  { %328 = vmatpush3.bf16.msra.mxu0 %v373_v7  ;;  %348 = vmatpush3.bf16.msra.mxu1 %v381_v12 }
  0x1f   :  { %329 = vmatprep.subr.bf16.mxu0 %v438_v1  ;;  %349 = vmatprep.subr.bf16.mxu1 %v438_v1 }
  0x22   :  { %330 = vmatpush3.bf16.msra.mxu0 %v374_v9  ;;  %350 = vmatpush3.bf16.msra.mxu1 %v382_v14 }
  0x23   :  { %331 = vmatprep.subr.bf16.mxu0 %v438_v1  ;;  %351 = vmatprep.subr.bf16.mxu1 %v438_v1 }
  0x26   :  { %332 = vmatpush3.bf16.msra.mxu0 %v375_v11  ;;  %352 = vmatpush3.bf16.msra.mxu1 %v383_v16 }
  0x27   :  { %333 = vmatprep.subr.bf16.mxu0 %v438_v1  ;;  %353 = vmatprep.subr.bf16.mxu1 %v438_v1 }
  0x2a   :  { %334 = vmatpush3.bf16.msra.mxu0 %v376_v13  ;;  %354 = vmatpush3.bf16.msra.mxu1 %v384_v17 }
  0x2b   :  { %335 = vmatprep.subr.bf16.mxu0 %v438_v1  ;;  %355 = vmatprep.subr.bf16.mxu1 %v438_v1 }
  0x2e   :  { %336 = vmatpush3.bf16.msra.mxu0 %v377_v15  ;;  %356 = vmatpush3.bf16.msra.mxu1 %v385_v22 }
  0x8c   :  { %v35_v20 = vpop.permute.xlu0 %34 }
  0x8d   :  { %vm36_vm1 = vcmp.eq.s32.totalorder %v35_v20, %v32_v19 }
  0x8e   :  { %vm292_vm2 = vmpackc.low %vm36_vm1, %vm36_vm1 }
  0x8f   :  { %338 = vmatmul.mubr.msk.bf16.vlgmr.msra.gmra.mxu0 %vm292_vm2, %v440_v21 }
 0x14f   :  { %v138_v23 = vpop.f32.mrf.mxu0 }
 0x150   :  { %v144_v24 = vpack.c.bf16 %v138_v23, %v138_v23 }
 0x151   :  { %v339_v25 = vpop.f32.mrf.mxu0 }
 0x152   :  { %358 = vmatmul.mubr.bf16.vlgmr.msra.gmra.mxu1 %v144_v24 }
 0x153   :  { %v141_v26 = vpop.f32.mrf.mxu0 }
 0x155   :  { %v340_v27 = vpop.f32.mrf.mxu0 }
 0x212   :  { %v251_v29 = vpop.f32.mrf.mxu1 }
 0x213   :  { %v252_v30 = vadd.f32 %v294_v28, %v251_v29 }
 0x214   :  { %v359_v31 = vpop.f32.mrf.mxu1 }
 0x215   :  { %257 = vmax.xlane.f32.xlu0 %v252_v30 }
 0x216   :  { %v254_v32 = vpop.f32.mrf.mxu1 }
 0x218   :  { %v360_v33 = vpop.f32.mrf.mxu1 }
 0x29e   :  { %v258_v34 = vpop.xlane.xlu0 %257 }
 0x29f   :  { %v259_v35 = vsub.f32 %v252_v30, %v258_v34 }
 0x2a1   :  { %v260_v36 = vmul.f32 1.442695, %v259_v35 }
 0x2a3   :  { %386 = vpow2.f32 %v260_v36 }
 0x2b0   :  { %v387_v37 = vpop.eup %386 }
 0x2b1   :  { %262 = vadd.xlane.f32.xlu1 %v387_v37 }
 0x33a   :  { %v263_v38 = vpop.xlane.xlu1 %262 }
 0x33b   :  { %388 = vlog2.f32 %v263_v38 }
 0x348   :  { %v389_v39 = vpop.eup %388 }
 0x349   :  { %v265_v40 = vmul.f32 0.6931472, %v389_v39 }
 0x34b   :  { %v266_v41 = vsub.f32 %v259_v35, %v265_v40 }
 0x34d   :  { %267 = vst [vmem:[#allocation5] sm:$0xff] %v266_v41 }
 0x34e   :  { %421 = shalt.err (!%p418_p9)
}
 0x34f   :  { %277 = dma.vmem_to_hbm [thread:$0]  %s275_s22, 128, %s477_s3, [#allocation4]  }
 0x350   :  { %432 = dma.done.wait [#allocation4], 128  }
 0x351   :  { %433 = vsyncadd [#allocation4], 4294967168 }
 0x352   :  { %281 = vsyncpa [#allocation3], 1 }
 0x353   :  { %282 = vsyncpa [#allocation4], 1 }

</bundles_post_ra>
